<compile_context>
chip_gen: v5e
topology: v5e:2x2
jax: 0.10.0
libtpu: 0.0.40
codegen_flags: <defaults>
</compile_context>

<pallas_src>
import functools

import jax
import jax.numpy as jnp
from jax import lax
from jax.experimental import pallas as pl
from jax.experimental.pallas import tpu as pltpu


def neural_encoder_kernel(x_ref, idx_ref,
                          w_ih_t_ref, w_hh_t_ref, b_ref,
                          w_out_ref, b_out_ref,
                          p_ref, logits_sc,
                          *, start_tok: int, end_tok: int):
    """One batch-block of the forward pass.

    x_ref      : (T, Bt, E)  compute_dtype  VMEM   time-major batch block
    idx_ref    : (Bt, T)     i32            VMEM   token indices
    w_ih_t_ref : (E, 4H)     compute_dtype  VMEM   transposed weight_ih, gate order (i,f,o,g)
    w_hh_t_ref : (H, 4H)     compute_dtype  VMEM   transposed weight_hh, gate order (i,f,o,g)
    b_ref      : (1, 4H)     f32            VMEM   bias_ih + bias_hh, gate order (i,f,o,g)
    w_out_ref  : (1, H)      f32            VMEM   Linear weight row
    b_out_ref  : (1, 1)      f32            SMEM   Linear bias
    p_ref      : (Bt, T)     f32            VMEM   output p_keep block
    logits_sc  : (Bt, T)     f32            VMEM   scratch for per-step logits
    """
    T, Bt, E = x_ref.shape
    H = w_hh_t_ref.shape[0]

    x = x_ref[...]                      # (T, Bt, E)
    w_ih_t = w_ih_t_ref[...]            # (E, 4H)
    w_hh_t = w_hh_t_ref[...]            # (H, 4H)
    b = b_ref[...]                      # (1, 4H) f32
    w_out_row = w_out_ref[...]          # (1, H)  f32
    b_out = b_out_ref[0, 0]

    # Input contribution to all gates for every timestep in one MXU matmul:
    # (T, Bt, E) x (E, 4H) -> (T, Bt, 4H), f32 accumulation.
    xg = lax.dot_general(
        x, w_ih_t,
        dimension_numbers=(((2,), (0,)), ((), ())),
        preferred_element_type=jnp.float32) + b

    h = jnp.zeros((Bt, H), jnp.float32)
    c = jnp.zeros((Bt, H), jnp.float32)

    # Sequential recurrence; T is small and static here -> Python-unrolled.
    # Live state is only (h, c); logits go straight to VMEM scratch.
    for t in range(T):
        gates = xg[t] + jnp.dot(h.astype(w_hh_t.dtype), w_hh_t,
                                preferred_element_type=jnp.float32)   # (Bt, 4H)

        # Gate order was permuted wrapper-side to (i, f, o, g): one sigmoid over
        # the contiguous [0:3H] slab + one tanh over [3H:4H] (single EUP unit).
        sig_ifo = jax.nn.sigmoid(gates[:, :3 * H])
        g_g = jnp.tanh(gates[:, 3 * H:])
        i_g = sig_ifo[:, 0 * H:1 * H]
        f_g = sig_ifo[:, 1 * H:2 * H]
        o_g = sig_ifo[:, 2 * H:3 * H]

        c = f_g * c + i_g * g_g
        h = o_g * jnp.tanh(c)

        # Fused output projection: w_out is (H, 1) so this is a VPU multiply +
        # XLU lane reduce; the result rides the store slot into VMEM scratch.
        logits_sc[:, t:t + 1] = jnp.sum(h * w_out_row, axis=-1, keepdims=True)

    p = jax.nn.sigmoid(logits_sc[...] + b_out)                        # (Bt, T)

    # masked_fill(idx == start, 1.0); masked_fill(idx == end, 1.0)
    idx = idx_ref[...]
    force_keep = (idx == start_tok) | (idx == end_tok)
    # TODO(synk): for large T or B, emit p time-major (T, Bt) for lane-dense
    # stores; at T=8 the masked store is negligible.
    p_ref[...] = jnp.where(force_keep, jnp.float32(1.0), p)           # single store


def _round_up(x, m):
    return ((x + m - 1) // m) * m


def _reorder_gate_rows(w, H):
    """Permute PyTorch's (i, f, g, o) gate blocks to (i, f, o, g) along axis 0."""
    i, f, g, o = w[:H], w[H:2 * H], w[2 * H:3 * H], w[3 * H:]
    return jnp.concatenate([i, f, o, g], axis=0)


def _auto_block_b(B):
    """Pick a batch block: whole (8-padded) batch when small, else 128 rows.

    128-row blocks fill the MXU rows / sublanes per recurrence step and keep
    >= 2 'parallel' blocks for large B so both v7x TensorCores get work.
    (256 is also reasonable on v6e/v7x when B is large enough for >= 2 blocks.)
    """
    Bp = _round_up(B, 8)
    return Bp if Bp <= 128 else 128


def neural_encoder_forward(x, idx, params, start_token_index, end_token_index,
                           *, block_b=None, compute_dtype=jnp.bfloat16):
    """Wrapper: layout glue, gate reorder, batch padding/tiling, pallas_call.

    compute_dtype=jnp.bfloat16 (default) uses bf16 MXU operands with f32
    accumulation on all TPU generations; pass jnp.float32 for bit-tight checks.
    """
    B, T, E = x.shape
    H = params["w_hh"].shape[1]
    if block_b is None:
        block_b = _auto_block_b(B)

    # Pad batch to a multiple of the block size (>= 8 sublanes per vreg).
    B_pad = _round_up(B, block_b)
    if B_pad != B:
        x = jnp.pad(x, ((0, B_pad - B), (0, 0), (0, 0)))
        idx = jnp.pad(idx, ((0, B_pad - B), (0, 0)), constant_values=-1)
    n_blocks = B_pad // block_b

    # Wrapper-side layout plumbing (XLA ops, outside the kernel).
    # TODO(synk): for large B*T*E, produce x time-major upstream to avoid the
    # extra HBM pass of this transpose.
    x_tbe = jnp.transpose(x, (1, 0, 2)).astype(compute_dtype)         # (T, B_pad, E)
    idx_i32 = idx.astype(jnp.int32)                                   # (B_pad, T)
    w_ih_t = _reorder_gate_rows(params["w_ih"], H).T.astype(compute_dtype)   # (E, 4H)
    w_hh_t = _reorder_gate_rows(params["w_hh"], H).T.astype(compute_dtype)   # (H, 4H)
    b = _reorder_gate_rows(
        (params["b_ih"] + params["b_hh"]).astype(jnp.float32), H).reshape(1, 4 * H)
    w_out_row = params["w_out"].reshape(1, H).astype(jnp.float32)     # (1, H)
    b_out = params["b_out"].reshape(1, 1).astype(jnp.float32)         # (1, 1)

    kernel = functools.partial(
        neural_encoder_kernel,
        start_tok=int(start_token_index),
        end_tok=int(end_token_index))

    p_pad = pl.pallas_call(
        kernel,
        out_shape=jax.ShapeDtypeStruct((B_pad, T), jnp.float32),
        grid=(n_blocks,),
        in_specs=[
            pl.BlockSpec((T, block_b, E), lambda bb: (0, bb, 0)),     # x (time-major)
            pl.BlockSpec((block_b, T), lambda bb: (bb, 0)),           # idx
            pl.BlockSpec((E, 4 * H), lambda bb: (0, 0)),              # w_ih_t (resident)
            pl.BlockSpec((H, 4 * H), lambda bb: (0, 0)),              # w_hh_t (resident)
            pl.BlockSpec((1, 4 * H), lambda bb: (0, 0)),              # bias
            pl.BlockSpec((1, H), lambda bb: (0, 0)),                  # w_out row
            pl.BlockSpec((1, 1), lambda bb: (0, 0),
                         memory_space=pltpu.MemorySpace.SMEM),        # b_out scalar
        ],
        out_specs=pl.BlockSpec((block_b, T), lambda bb: (bb, 0)),
        scratch_shapes=[pltpu.VMEM((block_b, T), jnp.float32)],       # per-step logits
        compiler_params=pltpu.CompilerParams(
            dimension_semantics=("parallel",),                        # 2 TCs on v7x
            vmem_limit_bytes=32 * 1024 * 1024),
    )(x_tbe, idx_i32, w_ih_t, w_hh_t, b, w_out_row, b_out)

    return p_pad[:B]


def neural_encoder_reference(x, idx, params, start_token_index, end_token_index):
    """Pure-JAX reference mirroring PyTorch semantics (for correctness check)."""
    B, T, E = x.shape
    H = params["w_hh"].shape[1]
    w_ih, w_hh = params["w_ih"], params["w_hh"]
    b = params["b_ih"] + params["b_hh"]

    def step(carry, x_t):
        h, c = carry
        gates = x_t @ w_ih.T + h @ w_hh.T + b
        i_g = jax.nn.sigmoid(gates[:, 0 * H:1 * H])
        f_g = jax.nn.sigmoid(gates[:, 1 * H:2 * H])
        g_g = jnp.tanh(gates[:, 2 * H:3 * H])
        o_g = jax.nn.sigmoid(gates[:, 3 * H:4 * H])
        c = f_g * c + i_g * g_g
        h = o_g * jnp.tanh(c)
        return (h, c), h

    h0 = jnp.zeros((B, H), jnp.float32)
    c0 = jnp.zeros((B, H), jnp.float32)
    _, hs = lax.scan(step, (h0, c0), jnp.transpose(x, (1, 0, 2)))
    h_all = jnp.transpose(hs, (1, 0, 2))                              # (B, T, H)
    p = jax.nn.sigmoid(h_all @ params["w_out"].T + params["b_out"])[..., 0]
    p = jnp.where(idx == start_token_index, 1.0, p)
    p = jnp.where(idx == end_token_index, 1.0, p)
    return p


if __name__ == "__main__":
    # Small shapes consistent with the module: batch=2, seq=8, embed=16, hidden=32
    B, T, E, H = 2, 8, 16, 32
    START_TOK, END_TOK = 0, 1
    VOCAB = 10

    key = jax.random.PRNGKey(0)
    kx, ki, k1, k2, k3, k4, k5, k6 = jax.random.split(key, 8)

    # Deterministic synthetic parameters (shapes match nn.LSTM / nn.Linear).
    params = {
        "w_ih": 0.1 * jax.random.normal(k1, (4 * H, E), jnp.float32),
        "w_hh": 0.1 * jax.random.normal(k2, (4 * H, H), jnp.float32),
        "b_ih": 0.1 * jax.random.normal(k3, (4 * H,), jnp.float32),
        "b_hh": 0.1 * jax.random.normal(k4, (4 * H,), jnp.float32),
        "w_out": 0.1 * jax.random.normal(k5, (1, H), jnp.float32),
        "b_out": 0.1 * jax.random.normal(k6, (1,), jnp.float32),
    }

    # Inputs: embeddings and token indices with start/end markers.
    x = jax.random.normal(kx, (B, T, E), jnp.float32)
    idx = jax.random.randint(ki, (B, T), 2, VOCAB, dtype=jnp.int32)
    idx = idx.at[:, 0].set(START_TOK)
    idx = idx.at[:, -1].set(END_TOK)

    p_ref = neural_encoder_reference(x, idx, params, START_TOK, END_TOK)

    # f32 operands: bit-tight correctness check.
    p_f32 = neural_encoder_forward(x, idx, params, START_TOK, END_TOK,
                                   compute_dtype=jnp.float32)
    p_f32 = jax.block_until_ready(p_f32)
    assert p_f32.shape == (B, T)
    assert jnp.allclose(p_f32, p_ref, atol=1e-5, rtol=1e-5), (
        f"f32 mismatch: max abs err = {jnp.max(jnp.abs(p_f32 - p_ref))}")

    # Default bf16 MXU operands (recommended path on v5e/v6e/v7x): looser check.
    p_bf16 = neural_encoder_forward(x, idx, params, START_TOK, END_TOK)
    p_bf16 = jax.block_until_ready(p_bf16)
    assert p_bf16.shape == (B, T)
    assert jnp.allclose(p_bf16, p_ref, atol=3e-2, rtol=3e-2), (
        f"bf16 mismatch: max abs err = {jnp.max(jnp.abs(p_bf16 - p_ref))}")

    print("KERNEL_OK")
</pallas_src>

<mosaic_0001>
module attributes {stable_mosaic.version = 11 : i64} {
  func.func @neural_encoder_kernel(%arg0: i32, %arg1: memref<8x8x16xf32, #tpu.memory_space<vmem>>, %arg2: memref<8x8xi32, #tpu.memory_space<vmem>>, %arg3: memref<16x128xf32, #tpu.memory_space<vmem>>, %arg4: memref<32x128xf32, #tpu.memory_space<vmem>>, %arg5: memref<1x128xf32, #tpu.memory_space<vmem>>, %arg6: memref<1x32xf32, #tpu.memory_space<vmem>>, %arg7: memref<1x1xf32, #tpu.memory_space<smem>>, %arg8: memref<8x8xf32, #tpu.memory_space<vmem>>, %arg9: memref<8x8xf32, #tpu.memory_space<vmem>>) attributes {dimension_semantics = [#tpu.dimension_semantics<parallel>], iteration_bounds = array<i64: 1>, scalar_prefetch = 0 : i64, scratch_operands = 1 : i64, tpu.core_type = #tpu.core_type<tc>, window_params = [{transform_indices = @transform_0, window_bounds = array<i64: 8, 8, 16>}, {transform_indices = @transform_1, window_bounds = array<i64: 8, 8>}, {pipeline_mode = #tpu.pipeline_mode<synchronous>, transform_indices = @transform_2, window_bounds = array<i64: 16, 128>}, {pipeline_mode = #tpu.pipeline_mode<synchronous>, transform_indices = @transform_3, window_bounds = array<i64: 32, 128>}, {pipeline_mode = #tpu.pipeline_mode<synchronous>, transform_indices = @transform_4, window_bounds = array<i64: 1, 128>}, {pipeline_mode = #tpu.pipeline_mode<synchronous>, transform_indices = @transform_5, window_bounds = array<i64: 1, 32>}, {transform_indices = @transform_6, window_bounds = array<i64: 1, 1>}, {transform_indices = @transform_7, window_bounds = array<i64: 8, 8>}]} {
    %c0 = arith.constant 0 : index
    %c0_0 = arith.constant 0 : index
    %c0_1 = arith.constant 0 : index
    %0 = vector.load %arg1[%c0, %c0_0, %c0_1] : memref<8x8x16xf32, #tpu.memory_space<vmem>>, vector<8x8x16xf32>
    %c0_2 = arith.constant 0 : index
    %c0_3 = arith.constant 0 : index
    %1 = vector.load %arg3[%c0_2, %c0_3] : memref<16x128xf32, #tpu.memory_space<vmem>>, vector<16x128xf32>
    %c0_4 = arith.constant 0 : index
    %c0_5 = arith.constant 0 : index
    %2 = vector.load %arg4[%c0_4, %c0_5] : memref<32x128xf32, #tpu.memory_space<vmem>>, vector<32x128xf32>
    %c0_6 = arith.constant 0 : index
    %c0_7 = arith.constant 0 : index
    %3 = vector.load %arg5[%c0_6, %c0_7] : memref<1x128xf32, #tpu.memory_space<vmem>>, vector<1x128xf32>
    %c0_8 = arith.constant 0 : index
    %c0_9 = arith.constant 0 : index
    %4 = vector.load %arg6[%c0_8, %c0_9] : memref<1x32xf32, #tpu.memory_space<vmem>>, vector<1x32xf32>
    %c0_10 = arith.constant 0 : index
    %c0_11 = arith.constant 0 : index
    %5 = memref.load %arg7[%c0_10, %c0_11] : memref<1x1xf32, #tpu.memory_space<smem>>
    %cst = arith.constant dense<0.000000e+00> : vector<8x8x128xf32>
    %6 = tpu.matmul %0, %1, %cst {dimension_numbers = #tpu.dot_dimension_numbers<[2], [0], [0, 1], [1], [0, 0, 0, 1, 1, 1], [], []>} : vector<8x8x16xf32>, vector<16x128xf32>, vector<8x8x128xf32> -> vector<8x8x128xf32>
    %7 = vector.shape_cast %3 : vector<1x128xf32> to vector<1x1x128xf32>
    %8 = vector.broadcast %7 : vector<1x1x128xf32> to vector<8x8x128xf32>
    %9 = arith.addf %6, %8 : vector<8x8x128xf32>
    %cst_12 = arith.constant 0.000000e+00 : f32
    %10 = vector.broadcast %cst_12 : f32 to vector<8x32xf32>
    %cst_13 = arith.constant 0.000000e+00 : f32
    %11 = vector.broadcast %cst_13 : f32 to vector<8x32xf32>
    %12 = vector.extract_strided_slice %9 {offsets = [0, 0, 0], sizes = [1, 8, 128], strides = [1, 1, 1]} : vector<8x8x128xf32> to vector<1x8x128xf32>
    %13 = vector.shape_cast %12 : vector<1x8x128xf32> to vector<8x128xf32>
    %cst_14 = arith.constant dense<0.000000e+00> : vector<8x128xf32>
    %14 = tpu.matmul %10, %2, %cst_14 {dimension_numbers = #tpu.dot_dimension_numbers<[1], [0], [0], [1], [0, 0, 1, 1], [], []>} : vector<8x32xf32>, vector<32x128xf32>, vector<8x128xf32> -> vector<8x128xf32>
    %15 = arith.addf %13, %14 : vector<8x128xf32>
    %16 = vector.extract_strided_slice %15 {offsets = [0, 0], sizes = [8, 96], strides = [1, 1]} : vector<8x128xf32> to vector<8x96xf32>
    %17 = arith.negf %16 : vector<8x96xf32>
    %18 = math.exp %17 : vector<8x96xf32>
    %cst_15 = arith.constant 1.000000e+00 : f32
    %19 = vector.broadcast %cst_15 : f32 to vector<8x96xf32>
    %20 = arith.addf %19, %18 : vector<8x96xf32>
    %21 = arith.divf %19, %20 : vector<8x96xf32>
    %22 = vector.extract_strided_slice %15 {offsets = [0, 96], sizes = [8, 32], strides = [1, 1]} : vector<8x128xf32> to vector<8x32xf32>
    %23 = math.tanh %22 : vector<8x32xf32>
    %24 = vector.extract_strided_slice %21 {offsets = [0, 0], sizes = [8, 32], strides = [1, 1]} : vector<8x96xf32> to vector<8x32xf32>
    %25 = vector.extract_strided_slice %21 {offsets = [0, 32], sizes = [8, 32], strides = [1, 1]} : vector<8x96xf32> to vector<8x32xf32>
    %26 = vector.extract_strided_slice %21 {offsets = [0, 64], sizes = [8, 32], strides = [1, 1]} : vector<8x96xf32> to vector<8x32xf32>
    %27 = arith.mulf %25, %11 : vector<8x32xf32>
    %28 = arith.mulf %24, %23 : vector<8x32xf32>
    %29 = arith.addf %27, %28 : vector<8x32xf32>
    %30 = math.tanh %29 : vector<8x32xf32>
    %31 = arith.mulf %26, %30 : vector<8x32xf32>
    %32 = vector.broadcast %4 : vector<1x32xf32> to vector<8x32xf32>
    %33 = arith.mulf %31, %32 : vector<8x32xf32>
    %cst_16 = arith.constant dense<0.000000e+00> : vector<8xf32>
    %34 = vector.multi_reduction <add>, %33, %cst_16 [1] : vector<8x32xf32> to vector<8xf32>
    %35 = vector.shape_cast %34 : vector<8xf32> to vector<8x1xf32>
    %c0_17 = arith.constant 0 : index
    %c0_18 = arith.constant 0 : index
    %36 = vector.load %arg9[%c0_17, %c0_18] : memref<8x8xf32, #tpu.memory_space<vmem>>, vector<8x1xf32>
    tpu.vector_store %arg9[%c0_17, %c0_18], %35 {strides = array<i32>} : memref<8x8xf32, #tpu.memory_space<vmem>>, vector<8x1xf32>,
    %37 = vector.extract_strided_slice %9 {offsets = [1, 0, 0], sizes = [1, 8, 128], strides = [1, 1, 1]} : vector<8x8x128xf32> to vector<1x8x128xf32>
    %38 = vector.shape_cast %37 : vector<1x8x128xf32> to vector<8x128xf32>
    %cst_19 = arith.constant dense<0.000000e+00> : vector<8x128xf32>
    %39 = tpu.matmul %31, %2, %cst_19 {dimension_numbers = #tpu.dot_dimension_numbers<[1], [0], [0], [1], [0, 0, 1, 1], [], []>} : vector<8x32xf32>, vector<32x128xf32>, vector<8x128xf32> -> vector<8x128xf32>
    %40 = arith.addf %38, %39 : vector<8x128xf32>
    %41 = vector.extract_strided_slice %40 {offsets = [0, 0], sizes = [8, 96], strides = [1, 1]} : vector<8x128xf32> to vector<8x96xf32>
    %42 = arith.negf %41 : vector<8x96xf32>
    %43 = math.exp %42 : vector<8x96xf32>
    %cst_20 = arith.constant 1.000000e+00 : f32
    %44 = vector.broadcast %cst_20 : f32 to vector<8x96xf32>
    %45 = arith.addf %44, %43 : vector<8x96xf32>
    %46 = arith.divf %44, %45 : vector<8x96xf32>
    %47 = vector.extract_strided_slice %40 {offsets = [0, 96], sizes = [8, 32], strides = [1, 1]} : vector<8x128xf32> to vector<8x32xf32>
    %48 = math.tanh %47 : vector<8x32xf32>
    %49 = vector.extract_strided_slice %46 {offsets = [0, 0], sizes = [8, 32], strides = [1, 1]} : vector<8x96xf32> to vector<8x32xf32>
    %50 = vector.extract_strided_slice %46 {offsets = [0, 32], sizes = [8, 32], strides = [1, 1]} : vector<8x96xf32> to vector<8x32xf32>
    %51 = vector.extract_strided_slice %46 {offsets = [0, 64], sizes = [8, 32], strides = [1, 1]} : vector<8x96xf32> to vector<8x32xf32>
    %52 = arith.mulf %50, %29 : vector<8x32xf32>
    %53 = arith.mulf %49, %48 : vector<8x32xf32>
    %54 = arith.addf %52, %53 : vector<8x32xf32>
    %55 = math.tanh %54 : vector<8x32xf32>
    %56 = arith.mulf %51, %55 : vector<8x32xf32>
    %57 = vector.broadcast %4 : vector<1x32xf32> to vector<8x32xf32>
    %58 = arith.mulf %56, %57 : vector<8x32xf32>
    %cst_21 = arith.constant dense<0.000000e+00> : vector<8xf32>
    %59 = vector.multi_reduction <add>, %58, %cst_21 [1] : vector<8x32xf32> to vector<8xf32>
    %60 = vector.shape_cast %59 : vector<8xf32> to vector<8x1xf32>
    %c0_22 = arith.constant 0 : index
    %c1 = arith.constant 1 : index
    %61 = vector.load %arg9[%c0_22, %c1] : memref<8x8xf32, #tpu.memory_space<vmem>>, vector<8x1xf32>
    tpu.vector_store %arg9[%c0_22, %c1], %60 {strides = array<i32>} : memref<8x8xf32, #tpu.memory_space<vmem>>, vector<8x1xf32>,
    %62 = vector.extract_strided_slice %9 {offsets = [2, 0, 0], sizes = [1, 8, 128], strides = [1, 1, 1]} : vector<8x8x128xf32> to vector<1x8x128xf32>
    %63 = vector.shape_cast %62 : vector<1x8x128xf32> to vector<8x128xf32>
    %cst_23 = arith.constant dense<0.000000e+00> : vector<8x128xf32>
    %64 = tpu.matmul %56, %2, %cst_23 {dimension_numbers = #tpu.dot_dimension_numbers<[1], [0], [0], [1], [0, 0, 1, 1], [], []>} : vector<8x32xf32>, vector<32x128xf32>, vector<8x128xf32> -> vector<8x128xf32>
    %65 = arith.addf %63, %64 : vector<8x128xf32>
    %66 = vector.extract_strided_slice %65 {offsets = [0, 0], sizes = [8, 96], strides = [1, 1]} : vector<8x128xf32> to vector<8x96xf32>
    %67 = arith.negf %66 : vector<8x96xf32>
    %68 = math.exp %67 : vector<8x96xf32>
    %cst_24 = arith.constant 1.000000e+00 : f32
    %69 = vector.broadcast %cst_24 : f32 to vector<8x96xf32>
    %70 = arith.addf %69, %68 : vector<8x96xf32>
    %71 = arith.divf %69, %70 : vector<8x96xf32>
    %72 = vector.extract_strided_slice %65 {offsets = [0, 96], sizes = [8, 32], strides = [1, 1]} : vector<8x128xf32> to vector<8x32xf32>
    %73 = math.tanh %72 : vector<8x32xf32>
    %74 = vector.extract_strided_slice %71 {offsets = [0, 0], sizes = [8, 32], strides = [1, 1]} : vector<8x96xf32> to vector<8x32xf32>
    %75 = vector.extract_strided_slice %71 {offsets = [0, 32], sizes = [8, 32], strides = [1, 1]} : vector<8x96xf32> to vector<8x32xf32>
    %76 = vector.extract_strided_slice %71 {offsets = [0, 64], sizes = [8, 32], strides = [1, 1]} : vector<8x96xf32> to vector<8x32xf32>
    %77 = arith.mulf %75, %54 : vector<8x32xf32>
    %78 = arith.mulf %74, %73 : vector<8x32xf32>
    %79 = arith.addf %77, %78 : vector<8x32xf32>
    %80 = math.tanh %79 : vector<8x32xf32>
    %81 = arith.mulf %76, %80 : vector<8x32xf32>
    %82 = vector.broadcast %4 : vector<1x32xf32> to vector<8x32xf32>
    %83 = arith.mulf %81, %82 : vector<8x32xf32>
    %cst_25 = arith.constant dense<0.000000e+00> : vector<8xf32>
    %84 = vector.multi_reduction <add>, %83, %cst_25 [1] : vector<8x32xf32> to vector<8xf32>
    %85 = vector.shape_cast %84 : vector<8xf32> to vector<8x1xf32>
    %c0_26 = arith.constant 0 : index
    %c2 = arith.constant 2 : index
    %86 = vector.load %arg9[%c0_26, %c2] : memref<8x8xf32, #tpu.memory_space<vmem>>, vector<8x1xf32>
    tpu.vector_store %arg9[%c0_26, %c2], %85 {strides = array<i32>} : memref<8x8xf32, #tpu.memory_space<vmem>>, vector<8x1xf32>,
    %87 = vector.extract_strided_slice %9 {offsets = [3, 0, 0], sizes = [1, 8, 128], strides = [1, 1, 1]} : vector<8x8x128xf32> to vector<1x8x128xf32>
    %88 = vector.shape_cast %87 : vector<1x8x128xf32> to vector<8x128xf32>
    %cst_27 = arith.constant dense<0.000000e+00> : vector<8x128xf32>
    %89 = tpu.matmul %81, %2, %cst_27 {dimension_numbers = #tpu.dot_dimension_numbers<[1], [0], [0], [1], [0, 0, 1, 1], [], []>} : vector<8x32xf32>, vector<32x128xf32>, vector<8x128xf32> -> vector<8x128xf32>
    %90 = arith.addf %88, %89 : vector<8x128xf32>
    %91 = vector.extract_strided_slice %90 {offsets = [0, 0], sizes = [8, 96], strides = [1, 1]} : vector<8x128xf32> to vector<8x96xf32>
    %92 = arith.negf %91 : vector<8x96xf32>
    %93 = math.exp %92 : vector<8x96xf32>
    %cst_28 = arith.constant 1.000000e+00 : f32
    %94 = vector.broadcast %cst_28 : f32 to vector<8x96xf32>
    %95 = arith.addf %94, %93 : vector<8x96xf32>
    %96 = arith.divf %94, %95 : vector<8x96xf32>
    %97 = vector.extract_strided_slice %90 {offsets = [0, 96], sizes = [8, 32], strides = [1, 1]} : vector<8x128xf32> to vector<8x32xf32>
    %98 = math.tanh %97 : vector<8x32xf32>
    %99 = vector.extract_strided_slice %96 {offsets = [0, 0], sizes = [8, 32], strides = [1, 1]} : vector<8x96xf32> to vector<8x32xf32>
    %100 = vector.extract_strided_slice %96 {offsets = [0, 32], sizes = [8, 32], strides = [1, 1]} : vector<8x96xf32> to vector<8x32xf32>
    %101 = vector.extract_strided_slice %96 {offsets = [0, 64], sizes = [8, 32], strides = [1, 1]} : vector<8x96xf32> to vector<8x32xf32>
    %102 = arith.mulf %100, %79 : vector<8x32xf32>
    %103 = arith.mulf %99, %98 : vector<8x32xf32>
    %104 = arith.addf %102, %103 : vector<8x32xf32>
    %105 = math.tanh %104 : vector<8x32xf32>
    %106 = arith.mulf %101, %105 : vector<8x32xf32>
    %107 = vector.broadcast %4 : vector<1x32xf32> to vector<8x32xf32>
    %108 = arith.mulf %106, %107 : vector<8x32xf32>
    %cst_29 = arith.constant dense<0.000000e+00> : vector<8xf32>
    %109 = vector.multi_reduction <add>, %108, %cst_29 [1] : vector<8x32xf32> to vector<8xf32>
    %110 = vector.shape_cast %109 : vector<8xf32> to vector<8x1xf32>
    %c0_30 = arith.constant 0 : index
    %c3 = arith.constant 3 : index
    %111 = vector.load %arg9[%c0_30, %c3] : memref<8x8xf32, #tpu.memory_space<vmem>>, vector<8x1xf32>
    tpu.vector_store %arg9[%c0_30, %c3], %110 {strides = array<i32>} : memref<8x8xf32, #tpu.memory_space<vmem>>, vector<8x1xf32>,
    %112 = vector.extract_strided_slice %9 {offsets = [4, 0, 0], sizes = [1, 8, 128], strides = [1, 1, 1]} : vector<8x8x128xf32> to vector<1x8x128xf32>
    %113 = vector.shape_cast %112 : vector<1x8x128xf32> to vector<8x128xf32>
    %cst_31 = arith.constant dense<0.000000e+00> : vector<8x128xf32>
    %114 = tpu.matmul %106, %2, %cst_31 {dimension_numbers = #tpu.dot_dimension_numbers<[1], [0], [0], [1], [0, 0, 1, 1], [], []>} : vector<8x32xf32>, vector<32x128xf32>, vector<8x128xf32> -> vector<8x128xf32>
    %115 = arith.addf %113, %114 : vector<8x128xf32>
    %116 = vector.extract_strided_slice %115 {offsets = [0, 0], sizes = [8, 96], strides = [1, 1]} : vector<8x128xf32> to vector<8x96xf32>
    %117 = arith.negf %116 : vector<8x96xf32>
    %118 = math.exp %117 : vector<8x96xf32>
    %cst_32 = arith.constant 1.000000e+00 : f32
    %119 = vector.broadcast %cst_32 : f32 to vector<8x96xf32>
    %120 = arith.addf %119, %118 : vector<8x96xf32>
    %121 = arith.divf %119, %120 : vector<8x96xf32>
    %122 = vector.extract_strided_slice %115 {offsets = [0, 96], sizes = [8, 32], strides = [1, 1]} : vector<8x128xf32> to vector<8x32xf32>
    %123 = math.tanh %122 : vector<8x32xf32>
    %124 = vector.extract_strided_slice %121 {offsets = [0, 0], sizes = [8, 32], strides = [1, 1]} : vector<8x96xf32> to vector<8x32xf32>
    %125 = vector.extract_strided_slice %121 {offsets = [0, 32], sizes = [8, 32], strides = [1, 1]} : vector<8x96xf32> to vector<8x32xf32>
    %126 = vector.extract_strided_slice %121 {offsets = [0, 64], sizes = [8, 32], strides = [1, 1]} : vector<8x96xf32> to vector<8x32xf32>
    %127 = arith.mulf %125, %104 : vector<8x32xf32>
    %128 = arith.mulf %124, %123 : vector<8x32xf32>
    %129 = arith.addf %127, %128 : vector<8x32xf32>
    %130 = math.tanh %129 : vector<8x32xf32>
    %131 = arith.mulf %126, %130 : vector<8x32xf32>
    %132 = vector.broadcast %4 : vector<1x32xf32> to vector<8x32xf32>
    %133 = arith.mulf %131, %132 : vector<8x32xf32>
    %cst_33 = arith.constant dense<0.000000e+00> : vector<8xf32>
    %134 = vector.multi_reduction <add>, %133, %cst_33 [1] : vector<8x32xf32> to vector<8xf32>
    %135 = vector.shape_cast %134 : vector<8xf32> to vector<8x1xf32>
    %c0_34 = arith.constant 0 : index
    %c4 = arith.constant 4 : index
    %136 = vector.load %arg9[%c0_34, %c4] : memref<8x8xf32, #tpu.memory_space<vmem>>, vector<8x1xf32>
    tpu.vector_store %arg9[%c0_34, %c4], %135 {strides = array<i32>} : memref<8x8xf32, #tpu.memory_space<vmem>>, vector<8x1xf32>,
    %137 = vector.extract_strided_slice %9 {offsets = [5, 0, 0], sizes = [1, 8, 128], strides = [1, 1, 1]} : vector<8x8x128xf32> to vector<1x8x128xf32>
    %138 = vector.shape_cast %137 : vector<1x8x128xf32> to vector<8x128xf32>
    %cst_35 = arith.constant dense<0.000000e+00> : vector<8x128xf32>
    %139 = tpu.matmul %131, %2, %cst_35 {dimension_numbers = #tpu.dot_dimension_numbers<[1], [0], [0], [1], [0, 0, 1, 1], [], []>} : vector<8x32xf32>, vector<32x128xf32>, vector<8x128xf32> -> vector<8x128xf32>
    %140 = arith.addf %138, %139 : vector<8x128xf32>
    %141 = vector.extract_strided_slice %140 {offsets = [0, 0], sizes = [8, 96], strides = [1, 1]} : vector<8x128xf32> to vector<8x96xf32>
    %142 = arith.negf %141 : vector<8x96xf32>
    %143 = math.exp %142 : vector<8x96xf32>
    %cst_36 = arith.constant 1.000000e+00 : f32
    %144 = vector.broadcast %cst_36 : f32 to vector<8x96xf32>
    %145 = arith.addf %144, %143 : vector<8x96xf32>
    %146 = arith.divf %144, %145 : vector<8x96xf32>
    %147 = vector.extract_strided_slice %140 {offsets = [0, 96], sizes = [8, 32], strides = [1, 1]} : vector<8x128xf32> to vector<8x32xf32>
    %148 = math.tanh %147 : vector<8x32xf32>
    %149 = vector.extract_strided_slice %146 {offsets = [0, 0], sizes = [8, 32], strides = [1, 1]} : vector<8x96xf32> to vector<8x32xf32>
    %150 = vector.extract_strided_slice %146 {offsets = [0, 32], sizes = [8, 32], strides = [1, 1]} : vector<8x96xf32> to vector<8x32xf32>
    %151 = vector.extract_strided_slice %146 {offsets = [0, 64], sizes = [8, 32], strides = [1, 1]} : vector<8x96xf32> to vector<8x32xf32>
    %152 = arith.mulf %150, %129 : vector<8x32xf32>
    %153 = arith.mulf %149, %148 : vector<8x32xf32>
    %154 = arith.addf %152, %153 : vector<8x32xf32>
    %155 = math.tanh %154 : vector<8x32xf32>
    %156 = arith.mulf %151, %155 : vector<8x32xf32>
    %157 = vector.broadcast %4 : vector<1x32xf32> to vector<8x32xf32>
    %158 = arith.mulf %156, %157 : vector<8x32xf32>
    %cst_37 = arith.constant dense<0.000000e+00> : vector<8xf32>
    %159 = vector.multi_reduction <add>, %158, %cst_37 [1] : vector<8x32xf32> to vector<8xf32>
    %160 = vector.shape_cast %159 : vector<8xf32> to vector<8x1xf32>
    %c0_38 = arith.constant 0 : index
    %c5 = arith.constant 5 : index
    %161 = vector.load %arg9[%c0_38, %c5] : memref<8x8xf32, #tpu.memory_space<vmem>>, vector<8x1xf32>
    tpu.vector_store %arg9[%c0_38, %c5], %160 {strides = array<i32>} : memref<8x8xf32, #tpu.memory_space<vmem>>, vector<8x1xf32>,
    %162 = vector.extract_strided_slice %9 {offsets = [6, 0, 0], sizes = [1, 8, 128], strides = [1, 1, 1]} : vector<8x8x128xf32> to vector<1x8x128xf32>
    %163 = vector.shape_cast %162 : vector<1x8x128xf32> to vector<8x128xf32>
    %cst_39 = arith.constant dense<0.000000e+00> : vector<8x128xf32>
    %164 = tpu.matmul %156, %2, %cst_39 {dimension_numbers = #tpu.dot_dimension_numbers<[1], [0], [0], [1], [0, 0, 1, 1], [], []>} : vector<8x32xf32>, vector<32x128xf32>, vector<8x128xf32> -> vector<8x128xf32>
    %165 = arith.addf %163, %164 : vector<8x128xf32>
    %166 = vector.extract_strided_slice %165 {offsets = [0, 0], sizes = [8, 96], strides = [1, 1]} : vector<8x128xf32> to vector<8x96xf32>
    %167 = arith.negf %166 : vector<8x96xf32>
    %168 = math.exp %167 : vector<8x96xf32>
    %cst_40 = arith.constant 1.000000e+00 : f32
    %169 = vector.broadcast %cst_40 : f32 to vector<8x96xf32>
    %170 = arith.addf %169, %168 : vector<8x96xf32>
    %171 = arith.divf %169, %170 : vector<8x96xf32>
    %172 = vector.extract_strided_slice %165 {offsets = [0, 96], sizes = [8, 32], strides = [1, 1]} : vector<8x128xf32> to vector<8x32xf32>
    %173 = math.tanh %172 : vector<8x32xf32>
    %174 = vector.extract_strided_slice %171 {offsets = [0, 0], sizes = [8, 32], strides = [1, 1]} : vector<8x96xf32> to vector<8x32xf32>
    %175 = vector.extract_strided_slice %171 {offsets = [0, 32], sizes = [8, 32], strides = [1, 1]} : vector<8x96xf32> to vector<8x32xf32>
    %176 = vector.extract_strided_slice %171 {offsets = [0, 64], sizes = [8, 32], strides = [1, 1]} : vector<8x96xf32> to vector<8x32xf32>
    %177 = arith.mulf %175, %154 : vector<8x32xf32>
    %178 = arith.mulf %174, %173 : vector<8x32xf32>
    %179 = arith.addf %177, %178 : vector<8x32xf32>
    %180 = math.tanh %179 : vector<8x32xf32>
    %181 = arith.mulf %176, %180 : vector<8x32xf32>
    %182 = vector.broadcast %4 : vector<1x32xf32> to vector<8x32xf32>
    %183 = arith.mulf %181, %182 : vector<8x32xf32>
    %cst_41 = arith.constant dense<0.000000e+00> : vector<8xf32>
    %184 = vector.multi_reduction <add>, %183, %cst_41 [1] : vector<8x32xf32> to vector<8xf32>
    %185 = vector.shape_cast %184 : vector<8xf32> to vector<8x1xf32>
    %c0_42 = arith.constant 0 : index
    %c6 = arith.constant 6 : index
    %186 = vector.load %arg9[%c0_42, %c6] : memref<8x8xf32, #tpu.memory_space<vmem>>, vector<8x1xf32>
    tpu.vector_store %arg9[%c0_42, %c6], %185 {strides = array<i32>} : memref<8x8xf32, #tpu.memory_space<vmem>>, vector<8x1xf32>,
    %187 = vector.extract_strided_slice %9 {offsets = [7, 0, 0], sizes = [1, 8, 128], strides = [1, 1, 1]} : vector<8x8x128xf32> to vector<1x8x128xf32>
    %188 = vector.shape_cast %187 : vector<1x8x128xf32> to vector<8x128xf32>
    %cst_43 = arith.constant dense<0.000000e+00> : vector<8x128xf32>
    %189 = tpu.matmul %181, %2, %cst_43 {dimension_numbers = #tpu.dot_dimension_numbers<[1], [0], [0], [1], [0, 0, 1, 1], [], []>} : vector<8x32xf32>, vector<32x128xf32>, vector<8x128xf32> -> vector<8x128xf32>
    %190 = arith.addf %188, %189 : vector<8x128xf32>
    %191 = vector.extract_strided_slice %190 {offsets = [0, 0], sizes = [8, 96], strides = [1, 1]} : vector<8x128xf32> to vector<8x96xf32>
    %192 = arith.negf %191 : vector<8x96xf32>
    %193 = math.exp %192 : vector<8x96xf32>
    %cst_44 = arith.constant 1.000000e+00 : f32
    %194 = vector.broadcast %cst_44 : f32 to vector<8x96xf32>
    %195 = arith.addf %194, %193 : vector<8x96xf32>
    %196 = arith.divf %194, %195 : vector<8x96xf32>
    %197 = vector.extract_strided_slice %190 {offsets = [0, 96], sizes = [8, 32], strides = [1, 1]} : vector<8x128xf32> to vector<8x32xf32>
    %198 = math.tanh %197 : vector<8x32xf32>
    %199 = vector.extract_strided_slice %196 {offsets = [0, 0], sizes = [8, 32], strides = [1, 1]} : vector<8x96xf32> to vector<8x32xf32>
    %200 = vector.extract_strided_slice %196 {offsets = [0, 32], sizes = [8, 32], strides = [1, 1]} : vector<8x96xf32> to vector<8x32xf32>
    %201 = vector.extract_strided_slice %196 {offsets = [0, 64], sizes = [8, 32], strides = [1, 1]} : vector<8x96xf32> to vector<8x32xf32>
    %202 = arith.mulf %200, %179 : vector<8x32xf32>
    %203 = arith.mulf %199, %198 : vector<8x32xf32>
    %204 = arith.addf %202, %203 : vector<8x32xf32>
    %205 = math.tanh %204 : vector<8x32xf32>
    %206 = arith.mulf %201, %205 : vector<8x32xf32>
    %207 = vector.broadcast %4 : vector<1x32xf32> to vector<8x32xf32>
    %208 = arith.mulf %206, %207 : vector<8x32xf32>
    %cst_45 = arith.constant dense<0.000000e+00> : vector<8xf32>
    %209 = vector.multi_reduction <add>, %208, %cst_45 [1] : vector<8x32xf32> to vector<8xf32>
    %210 = vector.shape_cast %209 : vector<8xf32> to vector<8x1xf32>
    %c0_46 = arith.constant 0 : index
    %c7 = arith.constant 7 : index
    %211 = vector.load %arg9[%c0_46, %c7] : memref<8x8xf32, #tpu.memory_space<vmem>>, vector<8x1xf32>
    tpu.vector_store %arg9[%c0_46, %c7], %210 {strides = array<i32>} : memref<8x8xf32, #tpu.memory_space<vmem>>, vector<8x1xf32>,
    %c0_47 = arith.constant 0 : index
    %c0_48 = arith.constant 0 : index
    %212 = vector.load %arg9[%c0_47, %c0_48] : memref<8x8xf32, #tpu.memory_space<vmem>>, vector<8x8xf32>
    %213 = vector.broadcast %5 : f32 to vector<8x8xf32>
    %214 = arith.addf %212, %213 : vector<8x8xf32>
    %215 = arith.negf %214 : vector<8x8xf32>
    %216 = math.exp %215 : vector<8x8xf32>
    %cst_49 = arith.constant 1.000000e+00 : f32
    %217 = vector.broadcast %cst_49 : f32 to vector<8x8xf32>
    %218 = arith.addf %217, %216 : vector<8x8xf32>
    %219 = arith.divf %217, %218 : vector<8x8xf32>
    %c0_50 = arith.constant 0 : index
    %c0_51 = arith.constant 0 : index
    %220 = vector.load %arg2[%c0_50, %c0_51] : memref<8x8xi32, #tpu.memory_space<vmem>>, vector<8x8xi32>
    %c0_i32 = arith.constant 0 : i32
    %221 = vector.broadcast %c0_i32 : i32 to vector<8x8xi32>
    %222 = arith.cmpi eq, %220, %221 : vector<8x8xi32>
    %c1_i32 = arith.constant 1 : i32
    %223 = vector.broadcast %c1_i32 : i32 to vector<8x8xi32>
    %224 = arith.cmpi eq, %220, %223 : vector<8x8xi32>
    %225 = arith.ori %222, %224 : vector<8x8xi1>
    %cst_52 = arith.constant 1.000000e+00 : f32
    %226 = vector.broadcast %cst_52 : f32 to vector<8x8xf32>
    %227 = arith.select %225, %226, %219 : vector<8x8xi1>, vector<8x8xf32>
    %c0_53 = arith.constant 0 : index
    %c0_54 = arith.constant 0 : index
    %228 = vector.load %arg8[%c0_53, %c0_54] : memref<8x8xf32, #tpu.memory_space<vmem>>, vector<8x8xf32>
    tpu.vector_store %arg8[%c0_53, %c0_54], %227 {strides = array<i32>} : memref<8x8xf32, #tpu.memory_space<vmem>>, vector<8x8xf32>,
    return
  }
  func.func @transform_0(%arg0: i32) -> (i32, i32, i32) {
    %c0_i32 = arith.constant 0 : i32
    %c0_i32_0 = arith.constant 0 : i32
    %c0_i32_1 = arith.constant 0 : i32
    return %c0_i32, %arg0, %c0_i32_0 : i32, i32, i32
  }
  func.func @transform_1(%arg0: i32) -> (i32, i32) {
    %c0_i32 = arith.constant 0 : i32
    %c0_i32_0 = arith.constant 0 : i32
    return %arg0, %c0_i32 : i32, i32
  }
  func.func @transform_2(%arg0: i32) -> (i32, i32) {
    %c0_i32 = arith.constant 0 : i32
    %c0_i32_0 = arith.constant 0 : i32
    %c0_i32_1 = arith.constant 0 : i32
    return %c0_i32, %c0_i32_0 : i32, i32
  }
  func.func @transform_3(%arg0: i32) -> (i32, i32) {
    %c0_i32 = arith.constant 0 : i32
    %c0_i32_0 = arith.constant 0 : i32
    %c0_i32_1 = arith.constant 0 : i32
    return %c0_i32, %c0_i32_0 : i32, i32
  }
  func.func @transform_4(%arg0: i32) -> (i32, i32) {
    %c0_i32 = arith.constant 0 : i32
    %c0_i32_0 = arith.constant 0 : i32
    %c0_i32_1 = arith.constant 0 : i32
    return %c0_i32, %c0_i32_0 : i32, i32
  }
  func.func @transform_5(%arg0: i32) -> (i32, i32) {
    %c0_i32 = arith.constant 0 : i32
    %c0_i32_0 = arith.constant 0 : i32
    %c0_i32_1 = arith.constant 0 : i32
    return %c0_i32, %c0_i32_0 : i32, i32
  }
  func.func @transform_6(%arg0: i32) -> (i32, i32) {
    %c0_i32 = arith.constant 0 : i32
    %c0_i32_0 = arith.constant 0 : i32
    %c0_i32_1 = arith.constant 0 : i32
    return %c0_i32, %c0_i32_0 : i32, i32
  }
  func.func @transform_7(%arg0: i32) -> (i32, i32) {
    %c0_i32 = arith.constant 0 : i32
    %c0_i32_0 = arith.constant 0 : i32
    return %arg0, %c0_i32 : i32, i32
  }
}

</mosaic_0001>

<bundles_post_ra>
// kernel: tpu_custom_call.1
= control target key start
LH: loop header
LB: loop body
LE: loop exit
PB: predicated region body
PF: predicated region fallthrough
CT: control target
= control target key end

     0   :  { %13 = vsyncpa [#allocation5], 0  ;;  %s1271_s0 = inlined_call_operand.hbm [shape: f32[8,8,16], index: 0, kind: input, shape index: {}]   ;;  %s1272_s1 = inlined_call_operand.hbm [shape: s32[8,8], index: 1, kind: input, shape index: {}]   ;;  %s1273_s2 = inlined_call_operand.hbm [shape: f32[16,128], index: 2, kind: input, shape index: {}]   ;;  %s1274_s3 = inlined_call_operand.hbm [shape: f32[32,128], index: 3, kind: input, shape index: {}]   ;;  %s1275_s4 = inlined_call_operand.vmem [shape: f32[1,128], index: 4, kind: input, shape index: {}]   ;;  %s1276_s5 = inlined_call_operand.vmem [shape: f32[1,32], index: 5, kind: input, shape index: {}]   ;;  %s1277_s6 = inlined_call_operand.<no memory space> [shape: f32[1,1], index: 6, kind: input, shape index: {}]   ;;  %s1278_s7 = inlined_call_operand.hbm [shape: f32[8,8], index: 7, kind: output, shape index: {}]  }
   0x1   :  { %14 = vsyncpa [#allocation8], 0 }
   0x2   :  { %15 = vsyncpa [#allocation11], 0  ;;  %s35_s26 = sshll.u32 %s1272_s1, 4  ;;  %s36_s26 = int_to_ptr.hbm [resolvable:$true] %s35_s26 }
   0x3   :  { %16 = vsyncpa [#allocation6], 0  ;;  %s1045_s27 = smov [#allocation7]   ;;  %s21_s8 = sshll.u32 %s1271_s0, 4  ;;  %s22_s8 = int_to_ptr.hbm [resolvable:$true] %s21_s8 }
   0x4   :  { %s37_s28 = sshll.u32 %s1045_s27, 4  ;;  %s1046_s9 = smov [#allocation4]   ;;  %s38_s28 = int_to_ptr.vmem [resolvable:$true] %s37_s28 }
   0x5   :  { %40 = dma.hbm_to_vmem [thread:$0]  %s36_s26, 128, %s38_s28, [#allocation8]  }
   0x6   :  { %s23_s10 = sshll.u32 %s1046_s9, 4  ;;  %s1047_s11 = smov 128   ;;  %s24_s10 = int_to_ptr.vmem [resolvable:$true] %s23_s10 }
   0x7   :  { %s1048_s12 = smov 8   ;;  %s45_s1 = sshll.u32 %s1273_s2, 4  ;;  %s46_s1 = int_to_ptr.hbm [resolvable:$true] %s45_s1 }
   0x8   :  { %29 = dma.hbm_to_vmem [thread:$0]  %s22_s8, 1024, %s24_s10, [#allocation5], %s1047_s11, %s1047_s11, %s1048_s12  }
   0x9   :  { %s1049_s15 = smov [#allocation9]   ;;  %s58_s0 = sshll.u32 %s1274_s3, 4  ;;  %s59_s0 = int_to_ptr.hbm [resolvable:$true] %s58_s0 }
   0xa   :  { %s47_s16 = sshll.u32 %s1049_s15, 4  ;;  %s1050_s19 = smov [#allocation10]   ;;  %s48_s16 = int_to_ptr.vmem [resolvable:$true] %s47_s16 }
   0xb   :  { %53 = dma.hbm_to_vmem [thread:$0]  %s46_s1, 256, %s48_s16, [#allocation8], %s1047_s11, %s1047_s11, %s1048_s12  }
   0xc   :  { %s60_s20 = sshll.u32 %s1050_s19, 4  ;;  %s61_s20 = int_to_ptr.vmem [resolvable:$true] %s60_s20 }
   0xd   :  { %66 = dma.hbm_to_vmem [thread:$0]  %s59_s0, 512, %s61_s20, [#allocation11], %s1047_s11, %s1047_s11, %s1048_s12  }
   0xe   :  { %1037 = dma.done.wait [#allocation5], 1024  }
   0xf   :  { %1038 = vsyncadd [#allocation5], 4294966272 }
  0x10   :  { %1039 = dma.done.wait [#allocation8], 384  }
  0x11   :  { %1040 = vsyncadd [#allocation8], 4294966912 }
  0x12   :  { %1041 = dma.done.wait [#allocation11], 512  }
  0x13   :  { %1042 = vsyncadd [#allocation11], 4294966784  ;;  %v1107_v0 = vld [vmem:[#allocation10 + $0x18] sm:$0xff]  ;;  %v1109_v2 = vld [vmem:[#allocation10 + $0x10] sm:$0xff]  ;;  %vm109_vm0 = vcmask 130048   ;;  %v1051_v7 = vmov 0.0  }
  0x14   :  { %v98_v1 = vld [vmem:[#allocation9 + $0x8] sm:$0xff]  ;;  %191 = vmatpush.msra.mxu1 %v1107_v0  ;;  %v97_v3 = vld [vmem:[#allocation9] sm:$0xff]  ;;  %v89_v4 = vld [vmem:[#allocation4] sm:$0xff]  ;;  %269 = vmatpush.msra.mxu2 %v1107_v0  ;;  %s1052_s21 = smov 32   ;;  %vm175_vm5 = vcmask 261120   ;;  %s799_s28 = sshll.u32 %s1278_s7, 4  ;;  %s800_s28 = int_to_ptr.hbm [resolvable:$true] %s799_s28 }
  0x15   :  { %148 = vmatpush.msra.mxu0 %v98_v1  ;;  %v1112_v5 = vld [vmem:[#allocation10 + $0x8] sm:$0xff]  ;;  %835 = vmatpush.msra.mxu3 %v98_v1  ;;  %v1117_v6 = vld [vmem:[#allocation10] sm:$0xff]  ;;  %v90_v35 = vld [vmem:[#allocation4 + $0x8] sm:$0xff] }
  0x16   :  { %192 = vmatpush.msra.mxu1 %v1109_v2  ;;  %270 = vmatpush.msra.mxu2 %v1109_v2  ;;  %v1143_v8 = vld [vmem:[%s1275_s4] ss:$0 sm:$0xff]  ;;  %s1053_s4 = smov 64   ;;  %v94_v61 = vld [vmem:[#allocation4 + $0x28] sm:$0xff]  ;;  %v95_v62 = vld [vmem:[#allocation4 + $0x30] sm:$0xff] }
  0x17   :  { %149 = vmatpush.msra.mxu0 %v97_v3  ;;  %836 = vmatpush.msra.mxu3 %v97_v3  ;;  %v96_v63 = vld [vmem:[#allocation4 + $0x38] sm:$0xff] }
  0x18   :  { %811 = vmatmul.msk.f32.vlgmr.msra.gmra.mxu0 %vm109_vm0, %v89_v4  ;;  %193 = vmatpush.msra.mxu1 %v1112_v5  ;;  %v91_v4 = vld [vmem:[#allocation4 + $0x10] sm:$0xff] }
  0x19   :  { %271 = vmatpush.msra.mxu2 %v1112_v5  ;;  %342 = vmatpush.msrb.mxu3 %v1107_v0 }
  0x1a   :  { %194 = vmatpush.msra.mxu1 %v1117_v6  ;;  %816 = vmatmul.msk.f32.vlgmr.msra.gmra.mxu3 %vm109_vm0, %v94_v61 }
  0x1b   :  { %195 = vmatmul.f32.vlgmr.msra.gmra.mxu1 %v1051_v7  ;;  %272 = vmatpush.msra.mxu2 %v1117_v6 }
  0x1c   :  { %343 = vmatpush.msrb.mxu3 %v1109_v2  ;;  %415 = vmatpush.msrb.mxu1 %v1107_v0 }
  0x1d   :  { %488 = vmatpush.msrb.mxu2 %v1107_v0 }
  0x1e   :  { %344 = vmatpush.msrb.mxu3 %v1112_v5  ;;  %416 = vmatpush.msrb.mxu1 %v1109_v2 }
  0x1f   :  { %489 = vmatpush.msrb.mxu2 %v1109_v2 }
  0x20   :  { %345 = vmatpush.msrb.mxu3 %v1117_v6  ;;  %417 = vmatpush.msrb.mxu1 %v1112_v5 }
  0x21   :  { %490 = vmatpush.msrb.mxu2 %v1112_v5  ;;  %812 = vmatmul.msk.f32.gmra.mxu0 %vm109_vm0, %v90_v35 }
  0x22   :  { %418 = vmatpush.msrb.mxu1 %v1117_v6  ;;  %561 = vmatpush.msra.mxu3 %v1107_v0 }
  0x23   :  { %491 = vmatpush.msrb.mxu2 %v1117_v6  ;;  %817 = vmatmul.msk.f32.gmra.mxu3 %vm109_vm0, %v95_v62 }
  0x24   :  { %634 = vmatpush.msra.mxu1 %v1107_v0  ;;  %562 = vmatpush.msra.mxu3 %v1109_v2 }
  0x26   :  { %635 = vmatpush.msra.mxu1 %v1109_v2  ;;  %563 = vmatpush.msra.mxu3 %v1112_v5 }
  0x28   :  { %636 = vmatpush.msra.mxu1 %v1112_v5  ;;  %564 = vmatpush.msra.mxu3 %v1117_v6 }
  0x29   :  { %813 = vmatmul.msk.f32.gmra.mxu0 %vm109_vm0, %v91_v4 }
  0x2a   :  { %637 = vmatpush.msra.mxu1 %v1117_v6 }
  0x2b   :  { %818 = vmatmul.msk.f32.gmra.mxu3 %vm109_vm0, %v96_v63  ;;  %v93_v63 = vld [vmem:[#allocation4 + $0x20] sm:$0xff] }
  0x95   :  { %v151_v9 = vpop.f32.mrf.mxu0 }
  0x96   :  { %v152_v10 = vadd.f32 %v1143_v8, %v151_v9 }
  0x98   :  { %v196_v11 = vpop.f32.mrf.mxu1 }
  0x99   :  { %v199_v12 = vadd.f32 %v196_v11, %v152_v10 }
  0x9b   :  { %849 = vtanh.f32 %v199_v12  ;;  %v819_v14 = vmul.f32 -1.442695, %v199_v12 }
  0x9d   :  { %851 = vpow2.f32 %v819_v14 }
  0x9e   :  { %v154_v37 = vpop.f32.mrf.mxu0 }
  0x9f   :  { %v155_v38 = vadd.f32 %v1143_v8, %v154_v37 }
  0xa1   :  { %v850_v13 = vpop.eup %849 }
  0xa2   :  { %222 = vrot.lane.b32.xlu0 %v850_v13, %s1052_s21 }
  0xa3   :  { %v852_v15 = vpop.eup %851 }
  0xa4   :  { %v203_v16 = vadd.f32 1.0, %v852_v15 }
  0xa6   :  { %853 = vrcp.f32 %v203_v16  ;;  %v215_v22 = vand.u32 2147483648, %v203_v16  ;;  %vm209_vm2 = vweird.f32 %v203_v16  ;;  %v213_v23 = vand.u32 2147483647, %v203_v16  ;;  %v157_v7 = vpop.f32.mrf.mxu0 }
  0xa7   :  { %v158_v9 = vadd.f32 %v1143_v8, %v157_v7 }
  0xa8   :  { %v216_v25 = vor.u32 1.1754944e-38, %v215_v22  ;;  %vm214_vm4 = vcmp.eq.f32.partialorder %v213_v23, 8.507059e+37 }
  0xac   :  { %v854_v17 = vpop.eup %853 }
  0xad   :  { %v205_v18 = vmul.f32 %v854_v17, %v203_v16  ;;  %vm210_vm1 = vweird.f32 %v854_v17 }
  0xae   :  { %vm211_vm3 = vmor %vm209_vm2, %vm210_vm1 }
  0xaf   :  { %v206_v19 = vsub.f32 1.0, %v205_v18 }
  0xb1   :  { %v207_v20 = vmul.f32 %v854_v17, %v206_v19 }
  0xb3   :  { %v208_v21 = vadd.f32 %v854_v17, %v207_v20 }
  0xb5   :  { %v212_v24 = vsel %vm211_vm3, %v854_v17, %v208_v21 }
  0xb6   :  { %v217_v27 = vsel %vm214_vm4, %v216_v25, %v212_v24 }
  0xb7   :  { %v220_v29 = vmul.f32 0.0, %v217_v27 }
 0x114   :  { %v223_v26 = vpop.permute.xlu0 %222 }
 0x115   :  { %v225_v28 = vmul.f32 %v223_v26, %v217_v27 }
 0x117   :  { %227 = vrot.lane.b32.xlu0 %v225_v28, %s1052_s21 }
 0x189   :  { %v228_v30 = vpop.permute.xlu0 %227 }
 0x18a   :  { %v230_v31 = vadd.f32 %v228_v30, %v220_v29 }
 0x18c   :  { %855 = vtanh.f32 %v230_v31 }
 0x192   :  { %v856_v32 = vpop.eup %855 }
 0x193   :  { %233 = vrot.lane.b32.xlu1 %v856_v32, %s1052_s21  ;;  %v92_v32 = vld [vmem:[#allocation4 + $0x18] sm:$0xff] }
 0x194   :  { %814 = vmatmul.msk.f32.gmra.mxu0 %vm109_vm0, %v92_v32 }
 0x19c   :  { %815 = vmatmul.msk.f32.gmra.mxu0 %vm109_vm0, %v93_v63 }
 0x205   :  { %v234_v33 = vpop.permute.xlu1 %233 }
 0x206   :  { %v1149_v34 = vmul.f32 %v234_v33, %v217_v27 }
 0x208   :  { %253 = vrot.lane.b32.xlu1 %v1149_v34, %s1053_s4 }
 0x211   :  { %v160_v37 = vpop.f32.mrf.mxu0 }
 0x219   :  { %v163_v4 = vpop.f32.mrf.mxu0 }
 0x27a   :  { %v254_v36 = vpop.permute.xlu1 %253 }
 0x27b   :  { %820 = vmatmul.msk.f32.vlgmr.msra.gmra.mxu2 %vm175_vm5, %v254_v36 }
 0x27c   :  { %707 = vmatpush.msra.mxu2 %v1107_v0 }
 0x27e   :  { %708 = vmatpush.msra.mxu2 %v1109_v2  ;;  %v1176_v2 = vpop.f32.mrf.mxu3 }
 0x280   :  { %709 = vmatpush.msra.mxu2 %v1112_v5 }
 0x282   :  { %710 = vmatpush.msra.mxu2 %v1117_v6 }
 0x286   :  { %v1178_v5 = vpop.f32.mrf.mxu3 }
 0x28e   :  { %v1180_v6 = vpop.f32.mrf.mxu3 }
 0x2fe   :  { %v274_v39 = vpop.f32.mrf.mxu2 }
 0x2ff   :  { %v277_v40 = vadd.f32 %v274_v39, %v155_v38  ;;  %v161_v38 = vadd.f32 %v1143_v8, %v160_v37 }
 0x301   :  { %857 = vtanh.f32 %v277_v40  ;;  %v821_v42 = vmul.f32 -1.442695, %v277_v40 }
 0x303   :  { %859 = vpow2.f32 %v821_v42 }
 0x307   :  { %v858_v41 = vpop.eup %857 }
 0x308   :  { %300 = vrot.lane.b32.xlu2 %v858_v41, %s1052_s21 }
 0x309   :  { %v860_v43 = vpop.eup %859 }
 0x30a   :  { %v281_v44 = vadd.f32 1.0, %v860_v43 }
 0x30c   :  { %861 = vrcp.f32 %v281_v44  ;;  %v293_v50 = vand.u32 2147483648, %v281_v44  ;;  %vm287_vm7 = vweird.f32 %v281_v44  ;;  %v291_v51 = vand.u32 2147483647, %v281_v44 }
 0x30e   :  { %v294_v53 = vor.u32 1.1754944e-38, %v293_v50  ;;  %vm292_vm9 = vcmp.eq.f32.partialorder %v291_v51, 8.507059e+37 }
 0x312   :  { %v862_v45 = vpop.eup %861 }
 0x313   :  { %v283_v46 = vmul.f32 %v862_v45, %v281_v44  ;;  %vm288_vm6 = vweird.f32 %v862_v45 }
 0x314   :  { %vm289_vm8 = vmor %vm287_vm7, %vm288_vm6 }
 0x315   :  { %v284_v47 = vsub.f32 1.0, %v283_v46 }
 0x317   :  { %v285_v48 = vmul.f32 %v862_v45, %v284_v47 }
 0x319   :  { %v286_v49 = vadd.f32 %v862_v45, %v285_v48 }
 0x31b   :  { %v290_v52 = vsel %vm289_vm8, %v862_v45, %v286_v49 }
 0x31c   :  { %v295_v55 = vsel %vm292_vm9, %v294_v53, %v290_v52 }
 0x31d   :  { %v298_v57 = vmul.f32 %v295_v55, %v230_v31 }
 0x362   :  { %v301_v54 = vpop.permute.xlu2 %300 }
 0x363   :  { %v303_v56 = vmul.f32 %v301_v54, %v295_v55 }
 0x365   :  { %305 = vrot.lane.b32.xlu2 %v303_v56, %s1052_s21 }
 0x3bf   :  { %v306_v58 = vpop.permute.xlu2 %305 }
 0x3c0   :  { %v308_v59 = vadd.f32 %v306_v58, %v298_v57 }
 0x3c2   :  { %863 = vtanh.f32 %v308_v59 }
 0x3c8   :  { %v864_v60 = vpop.eup %863 }
 0x3c9   :  { %311 = vrot.lane.b32.xlu0 %v864_v60, %s1052_s21 }
 0x43b   :  { %v312_v1 = vpop.permute.xlu0 %311 }
 0x43c   :  { %v1170_v3 = vmul.f32 %v312_v1, %v295_v55 }
 0x43e   :  { %326 = vrot.lane.b32.xlu1 %v1170_v3, %s1053_s4 }
 0x4b0   :  { %v327_v0 = vpop.permute.xlu1 %326 }
 0x4b1   :  { %822 = vmatmul.msk.f32.vlgmr.msrb.gmra.mxu3 %vm175_vm5, %v327_v0  ;;  %v164_v0 = vadd.f32 %v1143_v8, %v163_v4 }
 0x534   :  { %v347_v10 = vpop.f32.mrf.mxu3 }
 0x535   :  { %v350_v11 = vadd.f32 %v347_v10, %v158_v9 }
 0x537   :  { %865 = vtanh.f32 %v350_v11  ;;  %v823_v13 = vmul.f32 -1.442695, %v350_v11 }
 0x539   :  { %867 = vpow2.f32 %v823_v13 }
 0x53d   :  { %v866_v12 = vpop.eup %865 }
 0x53e   :  { %373 = vrot.lane.b32.xlu2 %v866_v12, %s1052_s21 }
 0x53f   :  { %v868_v14 = vpop.eup %867 }
 0x540   :  { %v354_v15 = vadd.f32 1.0, %v868_v14 }
 0x542   :  { %869 = vrcp.f32 %v354_v15  ;;  %v366_v21 = vand.u32 2147483648, %v354_v15  ;;  %vm360_vm11 = vweird.f32 %v354_v15  ;;  %v364_v22 = vand.u32 2147483647, %v354_v15 }
 0x544   :  { %v367_v24 = vor.u32 1.1754944e-38, %v366_v21  ;;  %vm365_vm13 = vcmp.eq.f32.partialorder %v364_v22, 8.507059e+37 }
 0x548   :  { %v870_v16 = vpop.eup %869 }
 0x549   :  { %v356_v17 = vmul.f32 %v870_v16, %v354_v15  ;;  %vm361_vm10 = vweird.f32 %v870_v16 }
 0x54a   :  { %vm362_vm12 = vmor %vm360_vm11, %vm361_vm10 }
 0x54b   :  { %v357_v18 = vsub.f32 1.0, %v356_v17 }
 0x54d   :  { %v358_v19 = vmul.f32 %v870_v16, %v357_v18 }
 0x54f   :  { %v359_v20 = vadd.f32 %v870_v16, %v358_v19 }
 0x551   :  { %v363_v23 = vsel %vm362_vm12, %v870_v16, %v359_v20 }
 0x552   :  { %v368_v26 = vsel %vm365_vm13, %v367_v24, %v363_v23 }
 0x553   :  { %v371_v28 = vmul.f32 %v368_v26, %v308_v59 }
 0x598   :  { %v374_v25 = vpop.permute.xlu2 %373 }
 0x599   :  { %v376_v27 = vmul.f32 %v374_v25, %v368_v26 }
 0x59b   :  { %378 = vrot.lane.b32.xlu0 %v376_v27, %s1052_s21 }
 0x60d   :  { %v379_v29 = vpop.permute.xlu0 %378 }
 0x60e   :  { %v381_v30 = vadd.f32 %v379_v29, %v371_v28 }
 0x610   :  { %871 = vtanh.f32 %v381_v30 }
 0x616   :  { %v872_v31 = vpop.eup %871 }
 0x617   :  { %384 = vrot.lane.b32.xlu1 %v872_v31, %s1052_s21 }
 0x689   :  { %v385_v33 = vpop.permute.xlu1 %384 }
 0x68a   :  { %v1187_v35 = vmul.f32 %v385_v33, %v368_v26  ;;  %v167_v33 = vadd.f32 %v1143_v8, %v1176_v2 }
 0x68c   :  { %399 = vrot.lane.b32.xlu2 %v1187_v35, %s1053_s4 }
 0x6e6   :  { %v400_v36 = vpop.permute.xlu2 %399 }
 0x6e7   :  { %824 = vmatmul.msk.f32.vlgmr.msrb.gmra.mxu1 %vm175_vm5, %v400_v36 }
 0x764   :  { %v420_v39 = vpop.f32.mrf.mxu1 }
 0x765   :  { %v423_v40 = vadd.f32 %v420_v39, %v161_v38 }
 0x767   :  { %873 = vtanh.f32 %v423_v40  ;;  %v825_v42 = vmul.f32 -1.442695, %v423_v40 }
 0x769   :  { %875 = vpow2.f32 %v825_v42 }
 0x76d   :  { %v874_v41 = vpop.eup %873 }
 0x76e   :  { %446 = vrot.lane.b32.xlu0 %v874_v41, %s1052_s21 }
 0x76f   :  { %v876_v43 = vpop.eup %875 }
 0x770   :  { %v427_v44 = vadd.f32 1.0, %v876_v43 }
 0x772   :  { %877 = vrcp.f32 %v427_v44  ;;  %v439_v50 = vand.u32 2147483648, %v427_v44  ;;  %vm433_vm15 = vweird.f32 %v427_v44  ;;  %v437_v51 = vand.u32 2147483647, %v427_v44 }
 0x774   :  { %v440_v53 = vor.u32 1.1754944e-38, %v439_v50  ;;  %vm438_vm2 = vcmp.eq.f32.partialorder %v437_v51, 8.507059e+37 }
 0x778   :  { %v878_v45 = vpop.eup %877 }
 0x779   :  { %v429_v46 = vmul.f32 %v878_v45, %v427_v44  ;;  %vm434_vm14 = vweird.f32 %v878_v45 }
 0x77a   :  { %vm435_vm1 = vmor %vm433_vm15, %vm434_vm14 }
 0x77b   :  { %v430_v47 = vsub.f32 1.0, %v429_v46 }
 0x77d   :  { %v431_v48 = vmul.f32 %v878_v45, %v430_v47 }
 0x77f   :  { %v432_v49 = vadd.f32 %v878_v45, %v431_v48 }
 0x781   :  { %v436_v52 = vsel %vm435_vm1, %v878_v45, %v432_v49 }
 0x782   :  { %v441_v55 = vsel %vm438_vm2, %v440_v53, %v436_v52 }
 0x783   :  { %v444_v57 = vmul.f32 %v441_v55, %v381_v30 }
 0x7e0   :  { %v447_v54 = vpop.permute.xlu0 %446 }
 0x7e1   :  { %v449_v56 = vmul.f32 %v447_v54, %v441_v55 }
 0x7e3   :  { %451 = vrot.lane.b32.xlu1 %v449_v56, %s1052_s21 }
 0x855   :  { %v452_v58 = vpop.permute.xlu1 %451 }
 0x856   :  { %v454_v59 = vadd.f32 %v452_v58, %v444_v57 }
 0x858   :  { %879 = vtanh.f32 %v454_v59 }
 0x85e   :  { %v880_v60 = vpop.eup %879 }
 0x85f   :  { %457 = vrot.lane.b32.xlu2 %v880_v60, %s1052_s21  ;;  %v170_v60 = vadd.f32 %v1143_v8, %v1178_v5 }
 0x8b9   :  { %v458_v61 = vpop.permute.xlu2 %457 }
 0x8ba   :  { %v1196_v62 = vmul.f32 %v458_v61, %v441_v55 }
 0x8bc   :  { %472 = vrot.lane.b32.xlu0 %v1196_v62, %s1053_s4 }
 0x92e   :  { %v473_v1 = vpop.permute.xlu0 %472 }
 0x92f   :  { %826 = vmatmul.msk.f32.vlgmr.msrb.gmra.mxu2 %vm175_vm5, %v473_v1 }
 0x9b2   :  { %v493_v7 = vpop.f32.mrf.mxu2 }
 0x9b3   :  { %v496_v9 = vadd.f32 %v493_v7, %v164_v0 }
 0x9b5   :  { %881 = vtanh.f32 %v496_v9  ;;  %v827_v11 = vmul.f32 -1.442695, %v496_v9 }
 0x9b7   :  { %883 = vpow2.f32 %v827_v11 }
 0x9bb   :  { %v882_v10 = vpop.eup %881 }
 0x9bc   :  { %519 = vrot.lane.b32.xlu1 %v882_v10, %s1052_s21 }
 0x9bd   :  { %v884_v12 = vpop.eup %883 }
 0x9be   :  { %v500_v13 = vadd.f32 1.0, %v884_v12 }
 0x9c0   :  { %885 = vrcp.f32 %v500_v13  ;;  %v512_v19 = vand.u32 2147483648, %v500_v13  ;;  %vm506_vm3 = vweird.f32 %v500_v13  ;;  %v510_v20 = vand.u32 2147483647, %v500_v13 }
 0x9c2   :  { %v513_v22 = vor.u32 1.1754944e-38, %v512_v19  ;;  %vm511_vm6 = vcmp.eq.f32.partialorder %v510_v20, 8.507059e+37 }
 0x9c6   :  { %v886_v14 = vpop.eup %885 }
 0x9c7   :  { %v502_v15 = vmul.f32 %v886_v14, %v500_v13  ;;  %vm507_vm0 = vweird.f32 %v886_v14 }
 0x9c8   :  { %vm508_vm4 = vmor %vm506_vm3, %vm507_vm0  ;;  %vm250_vm3 = vcmask 7168  }
 0x9c9   :  { %v503_v16 = vsub.f32 1.0, %v502_v15 }
 0x9cb   :  { %v504_v17 = vmul.f32 %v886_v14, %v503_v16 }
 0x9cd   :  { %v505_v18 = vadd.f32 %v886_v14, %v504_v17 }
 0x9cf   :  { %v509_v21 = vsel %vm508_vm4, %v886_v14, %v505_v18  ;;  %vm323_vm4 = vcmask 15368  }
 0x9d0   :  { %v514_v24 = vsel %vm511_vm6, %v513_v22, %v509_v21  ;;  %vm396_vm6 = vcmask 23568  }
 0x9d1   :  { %v517_v26 = vmul.f32 %v514_v24, %v454_v59 }
 0xa2e   :  { %v520_v23 = vpop.permute.xlu1 %519 }
 0xa2f   :  { %v522_v25 = vmul.f32 %v520_v23, %v514_v24 }
 0xa31   :  { %524 = vrot.lane.b32.xlu2 %v522_v25, %s1052_s21 }
 0xa8b   :  { %v525_v27 = vpop.permute.xlu2 %524 }
 0xa8c   :  { %v527_v28 = vadd.f32 %v525_v27, %v517_v26  ;;  %v848_v26 = vld [vmem:[%s1276_s5] ss:$0 sm:$0xff] }
 0xa8e   :  { %887 = vtanh.f32 %v527_v28 }
 0xa94   :  { %v888_v29 = vpop.eup %887 }
 0xa95   :  { %530 = vrot.lane.b32.xlu0 %v888_v29, %s1052_s21 }
 0xb07   :  { %v531_v30 = vpop.permute.xlu0 %530 }
 0xb08   :  { %v1206_v31 = vmul.f32 %v531_v30, %v514_v24 }
 0xb0a   :  { %545 = vrot.lane.b32.xlu1 %v1206_v31, %s1053_s4 }
 0xb7c   :  { %v546_v32 = vpop.permute.xlu1 %545 }
 0xb7d   :  { %828 = vmatmul.msk.f32.vlgmr.msra.gmra.mxu3 %vm175_vm5, %v546_v32 }
 0xc00   :  { %v566_v36 = vpop.f32.mrf.mxu3 }
 0xc01   :  { %v569_v37 = vadd.f32 %v566_v36, %v167_v33 }
 0xc03   :  { %889 = vtanh.f32 %v569_v37  ;;  %v829_v39 = vmul.f32 -1.442695, %v569_v37 }
 0xc05   :  { %891 = vpow2.f32 %v829_v39 }
 0xc09   :  { %v890_v38 = vpop.eup %889 }
 0xc0a   :  { %592 = vrot.lane.b32.xlu2 %v890_v38, %s1052_s21 }
 0xc0b   :  { %v892_v40 = vpop.eup %891 }
 0xc0c   :  { %v573_v41 = vadd.f32 1.0, %v892_v40 }
 0xc0e   :  { %893 = vrcp.f32 %v573_v41  ;;  %v585_v47 = vand.u32 2147483648, %v573_v41  ;;  %vm579_vm8 = vweird.f32 %v573_v41  ;;  %v583_v2 = vand.u32 2147483647, %v573_v41 }
 0xc10   :  { %v586_v49 = vor.u32 1.1754944e-38, %v585_v47  ;;  %vm584_vm10 = vcmp.eq.f32.partialorder %v583_v2, 8.507059e+37 }
 0xc14   :  { %v894_v42 = vpop.eup %893 }
 0xc15   :  { %v575_v43 = vmul.f32 %v894_v42, %v573_v41  ;;  %vm580_vm7 = vweird.f32 %v894_v42 }
 0xc16   :  { %vm581_vm9 = vmor %vm579_vm8, %vm580_vm7  ;;  %vm469_vm7 = vcmask 31768   ;;  %vm542_vm8 = vcmask 39968  }
 0xc17   :  { %v576_v44 = vsub.f32 1.0, %v575_v43 }
 0xc19   :  { %v577_v45 = vmul.f32 %v894_v42, %v576_v44 }
 0xc1b   :  { %v578_v46 = vadd.f32 %v894_v42, %v577_v45 }
 0xc1d   :  { %v582_v48 = vsel %vm581_vm9, %v894_v42, %v578_v46  ;;  %vm615_vm9 = vcmask 48168  }
 0xc1e   :  { %v587_v51 = vsel %vm584_vm10, %v586_v49, %v582_v48  ;;  %vm688_vm10 = vcmask 56368  }
 0xc1f   :  { %v590_v53 = vmul.f32 %v587_v51, %v527_v28  ;;  %v173_v28 = vadd.f32 %v1143_v8, %v1180_v6 }
 0xc64   :  { %v593_v50 = vpop.permute.xlu2 %592 }
 0xc65   :  { %v595_v52 = vmul.f32 %v593_v50, %v587_v51 }
 0xc67   :  { %597 = vrot.lane.b32.xlu0 %v595_v52, %s1052_s21 }
 0xcd9   :  { %v598_v54 = vpop.permute.xlu0 %597 }
 0xcda   :  { %v600_v55 = vadd.f32 %v598_v54, %v590_v53 }
 0xcdc   :  { %895 = vtanh.f32 %v600_v55 }
 0xce2   :  { %v896_v56 = vpop.eup %895 }
 0xce3   :  { %603 = vrot.lane.b32.xlu1 %v896_v56, %s1052_s21 }
 0xd55   :  { %v604_v57 = vpop.permute.xlu1 %603 }
 0xd56   :  { %v606_v58 = vmul.f32 %v604_v57, %v587_v51 }
 0xd58   :  { %618 = vrot.lane.b32.xlu2 %v606_v58, %s1053_s4 }
 0xdb2   :  { %v619_v59 = vpop.permute.xlu2 %618 }
 0xdb3   :  { %830 = vmatmul.msk.f32.vlgmr.msra.gmra.mxu1 %vm175_vm5, %v619_v59 }
 0xe30   :  { %v639_v61 = vpop.f32.mrf.mxu1 }
 0xe31   :  { %v642_v63 = vadd.f32 %v639_v61, %v170_v60 }
 0xe33   :  { %897 = vtanh.f32 %v642_v63  ;;  %v831_v4 = vmul.f32 -1.442695, %v642_v63 }
 0xe35   :  { %899 = vpow2.f32 %v831_v4 }
 0xe39   :  { %v898_v1 = vpop.eup %897 }
 0xe3a   :  { %665 = vrot.lane.b32.xlu0 %v898_v1, %s1052_s21 }
 0xe3b   :  { %v900_v0 = vpop.eup %899 }
 0xe3c   :  { %v646_v7 = vadd.f32 1.0, %v900_v0 }
 0xe3e   :  { %901 = vrcp.f32 %v646_v7  ;;  %v658_v14 = vand.u32 2147483648, %v646_v7  ;;  %vm652_vm12 = vweird.f32 %v646_v7  ;;  %v656_v5 = vand.u32 2147483647, %v646_v7 }
 0xe40   :  { %v659_v16 = vor.u32 1.1754944e-38, %v658_v14  ;;  %vm657_vm14 = vcmp.eq.f32.partialorder %v656_v5, 8.507059e+37 }
 0xe44   :  { %v902_v9 = vpop.eup %901 }
 0xe45   :  { %v648_v10 = vmul.f32 %v902_v9, %v646_v7  ;;  %vm653_vm11 = vweird.f32 %v902_v9 }
 0xe46   :  { %vm654_vm13 = vmor %vm652_vm12, %vm653_vm11  ;;  %vm761_vm11 = vcmask 64568  }
 0xe47   :  { %v649_v11 = vsub.f32 1.0, %v648_v10 }
 0xe49   :  { %v650_v12 = vmul.f32 %v902_v9, %v649_v11 }
 0xe4b   :  { %v651_v13 = vadd.f32 %v902_v9, %v650_v12 }
 0xe4d   :  { %v655_v15 = vsel %vm654_vm13, %v902_v9, %v651_v13 }
 0xe4e   :  { %v660_v18 = vsel %vm657_vm14, %v659_v16, %v655_v15 }
 0xe4f   :  { %v663_v20 = vmul.f32 %v660_v18, %v600_v55 }
 0xeac   :  { %v666_v17 = vpop.permute.xlu0 %665 }
 0xead   :  { %v668_v19 = vmul.f32 %v666_v17, %v660_v18 }
 0xeaf   :  { %670 = vrot.lane.b32.xlu1 %v668_v19, %s1052_s21 }
 0xf21   :  { %v671_v21 = vpop.permute.xlu1 %670 }
 0xf22   :  { %v673_v22 = vadd.f32 %v671_v21, %v663_v20 }
 0xf24   :  { %903 = vtanh.f32 %v673_v22 }
 0xf2a   :  { %v904_v23 = vpop.eup %903 }
 0xf2b   :  { %676 = vrot.lane.b32.xlu2 %v904_v23, %s1052_s21 }
 0xf85   :  { %v677_v24 = vpop.permute.xlu2 %676 }
 0xf86   :  { %v679_v25 = vmul.f32 %v677_v24, %v660_v18 }
 0xf88   :  { %691 = vrot.lane.b32.xlu0 %v679_v25, %s1053_s4 }
 0xf90   :  { %239 = vrot.lane.b32.xlu0 %v848_v26, %s1053_s4 }
 0xffa   :  { %v692_v27 = vpop.permute.xlu0 %691 }
 0xffb   :  { %832 = vmatmul.msk.f32.vlgmr.msra.gmra.mxu2 %vm175_vm5, %v692_v27 }
0x1002   :  { %v1232_v33 = vpop.permute.xlu0 %239 }
0x1003   :  { %v242_v36 = vmul.f32 %v1232_v33, %v1149_v34  ;;  %v315_v37 = vmul.f32 %v1170_v3, %v1232_v33  ;;  %v388_v8 = vmul.f32 %v1187_v35, %v1232_v33  ;;  %v461_v6 = vmul.f32 %v1196_v62, %v1232_v33 }
0x1004   :  { %v534_v34 = vmul.f32 %v1206_v31, %v1232_v33  ;;  %v607_v38 = vmul.f32 %v606_v58, %v1232_v33  ;;  %v680_v51 = vmul.f32 %v679_v25, %v1232_v33 }
0x107e   :  { %v712_v29 = vpop.f32.mrf.mxu2 }
0x107f   :  { %v715_v30 = vadd.f32 %v712_v29, %v173_v28 }
0x1081   :  { %905 = vtanh.f32 %v715_v30  ;;  %v833_v3 = vmul.f32 -1.442695, %v715_v30  ;;  %v785_v30 = vld [vmem:[#allocation7] sm:$0xff] }
0x1082   :  { %vm787_vm12 = vcmp.eq.s32.totalorder %v785_v30, 1 }
0x1083   :  { %907 = vpow2.f32 %v833_v3 }
0x1087   :  { %v906_v32 = vpop.eup %905 }
0x1088   :  { %738 = vrot.lane.b32.xlu1 %v906_v32, %s1052_s21 }
0x1089   :  { %v908_v39 = vpop.eup %907 }
0x108a   :  { %v719_v35 = vadd.f32 1.0, %v908_v39 }
0x108c   :  { %909 = vrcp.f32 %v719_v35  ;;  %v731_v44 = vand.u32 2147483648, %v719_v35  ;;  %vm725_vm1 = vweird.f32 %v719_v35  ;;  %v729_v31 = vand.u32 2147483647, %v719_v35 }
0x108e   :  { %v732_v46 = vor.u32 1.1754944e-38, %v731_v44  ;;  %vm730_vm0 = vcmp.eq.f32.partialorder %v729_v31, 8.507059e+37 }
0x1090   :  { %244 = vrot.lane.b32.xlu1 %v242_v36, %s1053_s4 }
0x1092   :  { %v910_v40 = vpop.eup %909 }
0x1093   :  { %v721_v41 = vmul.f32 %v910_v40, %v719_v35  ;;  %vm726_vm15 = vweird.f32 %v910_v40 }
0x1094   :  { %vm727_vm2 = vmor %vm725_vm1, %vm726_vm15 }
0x1095   :  { %v722_v42 = vsub.f32 1.0, %v721_v41 }
0x1097   :  { %v723_v62 = vmul.f32 %v910_v40, %v722_v42 }
0x1098   :  { %317 = vrot.lane.b32.xlu1 %v315_v37, %s1053_s4 }
0x1099   :  { %v724_v43 = vadd.f32 %v910_v40, %v723_v62 }
0x109b   :  { %v728_v45 = vsel %vm727_vm2, %v910_v40, %v724_v43 }
0x109c   :  { %v733_v2 = vsel %vm730_vm0, %v732_v46, %v728_v45  ;;  %vm790_vm0 = vcmask 64512  }
0x109d   :  { %v736_v54 = vmul.f32 %v733_v2, %v673_v22  ;;  %v764_v22 = vstv %s1277_s6  ;;  %s1054_s6 = smov [#allocation12]  }
0x109e   :  { %s797_s25 = sshll.u32 %s1054_s6, 4  ;;  %s798_s25 = int_to_ptr.vmem [resolvable:$true] %s797_s25 }
0x10a0   :  { %390 = vrot.lane.b32.xlu1 %v388_v8, %s1053_s4 }
0x10a8   :  { %463 = vrot.lane.b32.xlu1 %v461_v6, %s1053_s4 }
0x10b0   :  { %536 = vrot.lane.b32.xlu1 %v534_v34, %s1053_s4 }
0x10b8   :  { %609 = vrot.lane.b32.xlu1 %v607_v38, %s1053_s4 }
0x10fa   :  { %v739_v47 = vpop.permute.xlu1 %738 }
0x10fb   :  { %v741_v48 = vmul.f32 %v739_v47, %v733_v2 }
0x10fd   :  { %743 = vrot.lane.b32.xlu2 %v741_v48, %s1052_s21 }
0x1102   :  { %v245_v49 = vpop.permute.xlu1 %244 }
0x1103   :  { %v247_v50 = vsel %vm175_vm5, %v245_v49, 0.0 }
0x110a   :  { %v318_v52 = vpop.permute.xlu1 %317 }
0x110b   :  { %v320_v61 = vsel %vm175_vm5, %v318_v52, 0.0 }
0x1112   :  { %v391_v53 = vpop.permute.xlu1 %390 }
0x1113   :  { %v393_v14 = vsel %vm175_vm5, %v391_v53, 0.0 }
0x111a   :  { %v464_v57 = vpop.permute.xlu1 %463 }
0x111b   :  { %v466_v63 = vsel %vm175_vm5, %v464_v57, 0.0 }
0x1122   :  { %v537_v59 = vpop.permute.xlu1 %536 }
0x1123   :  { %v539_v60 = vsel %vm175_vm5, %v537_v59, 0.0 }
0x1126   :  { %248 = vadd.xlane.f32.xlu2 %v247_v50 }
0x112a   :  { %v610_v1 = vpop.permute.xlu1 %609 }
0x112b   :  { %v612_v0 = vsel %vm175_vm5, %v610_v1, 0.0 }
0x113e   :  { %682 = vrot.lane.b32.xlu2 %v680_v51, %s1053_s4 }
0x1157   :  { %v744_v55 = vpop.permute.xlu2 %743 }
0x1158   :  { %v746_v56 = vadd.f32 %v744_v55, %v736_v54 }
0x115a   :  { %911 = vtanh.f32 %v746_v56 }
0x1160   :  { %v912_v58 = vpop.eup %911 }
0x1161   :  { %749 = vrot.lane.b32.xlu0 %v912_v58, %s1052_s21 }
0x1167   :  { %540 = vadd.xlane.f32.xlu2 %v539_v60 }
0x118b   :  { %321 = vadd.xlane.f32.xlu0 %v320_v61 }
0x1193   :  { %467 = vadd.xlane.f32.xlu0 %v466_v63 }
0x1199   :  { %v249_v4 = vpop.xlane.xlu2 %248 }
0x119a   :  { %251 = vst.msk [vmem:[#allocation2] sm:$0xff] %vm250_vm3, %v249_v4 }
0x119b   :  { %613 = vadd.xlane.f32.xlu0 %v612_v0 }
0x11a1   :  { %v683_v7 = vpop.permute.xlu2 %682 }
0x11a2   :  { %v685_v9 = vsel %vm175_vm5, %v683_v7, 0.0 }
0x11a3   :  { %686 = vadd.xlane.f32.xlu0 %v685_v9 }
0x11d3   :  { %v750_v10 = vpop.permute.xlu0 %749 }
0x11d4   :  { %v752_v11 = vmul.f32 %v750_v10, %v733_v2 }
0x11d6   :  { %v753_v12 = vmul.f32 %v752_v11, %v1232_v33 }
0x11d8   :  { %755 = vrot.lane.b32.xlu1 %v753_v12, %s1053_s4 }
0x11da   :  { %v541_v19 = vpop.xlane.xlu2 %540 }
0x11fe   :  { %v322_v13 = vpop.xlane.xlu0 %321 }
0x11ff   :  { %324 = vst.msk [vmem:[#allocation2] sm:$0xff] %vm323_vm4, %v322_v13 }
0x1202   :  { %394 = vadd.xlane.f32.xlu1 %v393_v14 }
0x1206   :  { %v468_v16 = vpop.xlane.xlu0 %467 }
0x120e   :  { %v614_v17 = vpop.xlane.xlu0 %613 }
0x1216   :  { %v687_v20 = vpop.xlane.xlu0 %686 }
0x124a   :  { %v756_v5 = vpop.permute.xlu1 %755 }
0x124b   :  { %v758_v15 = vsel %vm175_vm5, %v756_v5, 0.0  ;;  %vm786_vm5 = vcmp.eq.s32.totalorder %v785_v30, 0 }
0x124c   :  { %759 = vadd.xlane.f32.xlu0 %v758_v15  ;;  %vm788_vm15 = vmor %vm786_vm5, %vm787_vm12 }
0x1275   :  { %v395_v18 = vpop.xlane.xlu1 %394 }
0x1276   :  { %397 = vst.msk [vmem:[#allocation2] sm:$0xff] %vm396_vm6, %v395_v18 }
0x1277   :  { %470 = vst.msk [vmem:[#allocation2] sm:$0xff] %vm469_vm7, %v468_v16 }
0x1278   :  { %543 = vst.msk [vmem:[#allocation2] sm:$0xff] %vm542_vm8, %v541_v19 }
0x1279   :  { %616 = vst.msk [vmem:[#allocation2] sm:$0xff] %vm615_vm9, %v614_v17 }
0x127a   :  { %689 = vst.msk [vmem:[#allocation2] sm:$0xff] %vm688_vm10, %v687_v20 }
0x12bf   :  { %v760_v21 = vpop.xlane.xlu0 %759 }
0x12c0   :  { %762 = vst.msk [vmem:[#allocation2] sm:$0xff] %vm761_vm11, %v760_v21 }
0x12c7   :  { %v763_v23 = vld [vmem:[#allocation2] sm:$0xff] }
0x12c8   :  { %v765_v24 = vadd.f32 %v764_v22, %v763_v23 }
0x12ca   :  { %v834_v25 = vmul.f32 -1.442695, %v765_v24 }
0x12cc   :  { %913 = vpow2.f32 %v834_v25 }
0x12d2   :  { %v914_v26 = vpop.eup %913 }
0x12d3   :  { %v769_v27 = vadd.f32 1.0, %v914_v26 }
0x12d5   :  { %915 = vrcp.f32 %v769_v27  ;;  %v781_v33 = vand.u32 2147483648, %v769_v27  ;;  %v779_v37 = vand.u32 2147483647, %v769_v27  ;;  %vm775_vm14 = vweird.f32 %v769_v27 }
0x12d7   :  { %v782_v6 = vor.u32 1.1754944e-38, %v781_v33  ;;  %vm780_vm2 = vcmp.eq.f32.partialorder %v779_v37, 8.507059e+37 }
0x12db   :  { %v916_v28 = vpop.eup %915 }
0x12dc   :  { %v771_v29 = vmul.f32 %v916_v28, %v769_v27  ;;  %vm776_vm13 = vweird.f32 %v916_v28 }
0x12dd   :  { %vm777_vm1 = vmor %vm775_vm14, %vm776_vm13 }
0x12de   :  { %v772_v32 = vsub.f32 1.0, %v771_v29 }
0x12e0   :  { %v773_v36 = vmul.f32 %v916_v28, %v772_v32 }
0x12e2   :  { %v774_v8 = vadd.f32 %v916_v28, %v773_v36 }
0x12e4   :  { %v778_v34 = vsel %vm777_vm1, %v916_v28, %v774_v8 }
0x12e5   :  { %v783_v38 = vsel %vm780_vm2, %v782_v6, %v778_v34 }
0x12e6   :  { %v789_v3 = vsel %vm788_vm15, 1.0, %v783_v38 }
0x12e7   :  { %791 = vst.msk [vmem:[#allocation12] sm:$0xff] %vm790_vm0, %v789_v3 }
0x12e8   :  { %802 = dma.vmem_to_hbm [thread:$0]  %s798_s25, 128, %s800_s28, [#allocation6]  }
0x12e9   :  { %1043 = dma.done.wait [#allocation6], 128  }
0x12ea   :  { %1044 = vsyncadd [#allocation6], 4294967168 }
0x12eb   :  { %807 = vsyncpa [#allocation5], 1 }
0x12ec   :  { %808 = vsyncpa [#allocation8], 1 }
0x12ed   :  { %809 = vsyncpa [#allocation11], 1 }
0x12ee   :  { %810 = vsyncpa [#allocation6], 1 }

</bundles_post_ra>
